<compile_context>
chip_gen: v7x
topology: tpu7x:2x2x1
jax: 0.10.0
libtpu: 0.0.40
codegen_flags: <defaults>
</compile_context>

<pallas_src>
import math
import jax
import jax.numpy as jnp
from jax.experimental import pallas as pl
from jax.experimental.pallas import tpu as pltpu

INIT_SIGMA = 0.5
FACTORIZED = True


def _round_up(x, m):
    return ((x + m - 1) // m) * m


def _f_transform(v):
    # f(v) = sign(v) * sqrt(|v|)
    return jnp.sign(v) * jnp.sqrt(jnp.abs(v))


def _pad2(a, r, c):
    return jnp.pad(a, ((0, r - a.shape[0]), (0, c - a.shape[1])))


# --------------------------------------------------------------------------- #
# Kernel: one (n, k) grid step of
#   y = x @ W^T + f(eps_out) * ((x * f(eps_in)) @ NW^T) + b_eff
# --------------------------------------------------------------------------- #
def _noisy_linear_kernel(x_ref, wT_ref, nwT_ref, b_ref, nb_ref,
                         eps_in_ref, eps_out_ref, o_ref, acc_ref):
    k = pl.program_id(1)

    @pl.when(k == 0)
    def _():
        acc_ref[...] = jnp.zeros_like(acc_ref)

    x = x_ref[...]                       # (Bp, tk)  activation dtype
    eps_in = eps_in_ref[...]             # (1, tk)   f32, already f(.)-transformed
    eps_out = eps_out_ref[...]           # (1, tn)   f32, already f(.)-transformed

    # Clean term: x @ W^T  (RHS stored pre-transposed as (K, N)).
    part = jnp.dot(x, wT_ref[...], preferred_element_type=jnp.float32)

    # Noisy term: scale x rows by f(eps_in), matmul vs NW^T, scale cols by
    # f(eps_out).  Note: for bf16 activations xn is rounded back to bf16 before
    # the MXU — a slightly looser numeric contract than the f32 W_eff path
    # (covered by the bf16 tolerance below).
    xn = (x.astype(jnp.float32) * eps_in).astype(x.dtype)
    part += eps_out * jnp.dot(xn, nwT_ref[...], preferred_element_type=jnp.float32)

    acc_ref[...] += part

    @pl.when(k == pl.num_programs(1) - 1)
    def _():
        b_eff = b_ref[...] + nb_ref[...] * eps_out        # all f32, (1, tn)
        o_ref[...] = (acc_ref[...] + b_eff).astype(o_ref.dtype)


# --------------------------------------------------------------------------- #
# Cold path: prepare parameters ONCE (transpose + pad + dtype cast).
# --------------------------------------------------------------------------- #
def prepare_noisy_linear_params(weight, noisy_weight, bias, noisy_bias, *,
                                param_dtype=jnp.bfloat16,
                                block_n=None, block_k=None):
    """weight/noisy_weight: (out, in) torch layout. bias/noisy_bias: (out,).

    Returns a dict of kernel-ready arrays: weights pre-transposed to (K, N),
    lane-padded, stored in `param_dtype` (bf16 default); biases kept f32.
    Do this at init / param update time, NOT per forward call."""
    out_f, in_f = weight.shape
    itemsize = jnp.dtype(param_dtype).itemsize
    # dtype-aware tile default: keeps v5e's 16 MiB scoped VMEM default safe for
    # f32 while letting bf16 use larger, overhead-amortizing tiles.
    default_block = 1024 if itemsize <= 2 else 512
    bn = block_n if block_n is not None else default_block
    bk = block_k if block_k is not None else default_block

    tk = min(_round_up(in_f, 128), bk)
    tn = min(_round_up(out_f, 128), bn)
    K = _round_up(in_f, tk)
    N = _round_up(out_f, tn)

    wT_p = _pad2(weight.T.astype(param_dtype), K, N)          # (K, N)
    nwT_p = _pad2(noisy_weight.T.astype(param_dtype), K, N)   # (K, N)
    b_p = jnp.pad(bias.astype(jnp.float32), (0, N - out_f)).reshape(1, N)
    nb_p = jnp.pad(noisy_bias.astype(jnp.float32), (0, N - out_f)).reshape(1, N)

    return dict(wT=wT_p, nwT=nwT_p, b=b_p, nb=nb_p,
                in_features=in_f, out_features=out_f,
                K=K, N=N, tk=tk, tn=tn, param_dtype=param_dtype)


# --------------------------------------------------------------------------- #
# Hot path: forward.
# --------------------------------------------------------------------------- #
def noisy_linear_forward(x, params, eps_in_raw, eps_out_raw):
    """x: (B, in). params: output of prepare_noisy_linear_params.
    eps_in_raw: (in,), eps_out_raw: (out,) raw gaussians (drawn per forward)."""
    B, in_f = x.shape
    assert in_f == params["in_features"]
    out_f = params["out_features"]
    K, N, tk, tn = params["K"], params["N"], params["tk"], params["tn"]
    out_dtype = x.dtype

    # f(v) computed once per forward, in f32 (tiny (K,) / (N,) vectors).
    ein_p = jnp.pad(_f_transform(eps_in_raw.astype(jnp.float32)),
                    (0, K - in_f)).reshape(1, K)
    eout_p = jnp.pad(_f_transform(eps_out_raw.astype(jnp.float32)),
                     (0, N - out_f)).reshape(1, N)

    # Batch pad rounded to the activation dtype's sublane packing.
    x_itemsize = jnp.dtype(x.dtype).itemsize
    sublane = 8 * max(1, 4 // x_itemsize)            # 8 f32 / 16 bf16 / 32 i8
    Bp = _round_up(max(B, 1), sublane)
    x_p = _pad2(x, Bp, K)

    grid = (N // tn, K // tk)   # N "parallel" (megacore on v7x), K reduction last

    # VMEM footprint estimate (double-buffered tiles + accumulator); only raise
    # the scoped limit when a large-tile config actually needs it.
    w_itemsize = jnp.dtype(params["param_dtype"]).itemsize
    vmem_est = (2 * 2 * tk * tn * w_itemsize          # W^T + NW^T, 2 bufs each
                + 2 * Bp * tk * x_itemsize            # x, 2 bufs
                + 2 * Bp * tn * jnp.dtype(out_dtype).itemsize
                + Bp * tn * 4                         # f32 accumulator
                + 2 * (3 * tn + tk) * 4)              # bias/noisy_bias/eps rows
    if vmem_est > 30 * 1024 * 1024:
        compiler_params = pltpu.CompilerParams(
            dimension_semantics=("parallel", "arbitrary"),
            vmem_limit_bytes=min(int(vmem_est * 5 // 4), 112 * 1024 * 1024))
    else:
        compiler_params = pltpu.CompilerParams(
            dimension_semantics=("parallel", "arbitrary"))

    # TODO(synk): for large B, keep x fully resident in VMEM (or add a batch
    # grid axis) so it is not re-streamed for every N tile.
    out_p = pl.pallas_call(
        _noisy_linear_kernel,
        out_shape=jax.ShapeDtypeStruct((Bp, N), out_dtype),
        grid_spec=pltpu.PrefetchScalarGridSpec(
            num_scalar_prefetch=0,
            grid=grid,
            in_specs=[
                pl.BlockSpec((Bp, tk), lambda n, k: (0, k)),   # x
                pl.BlockSpec((tk, tn), lambda n, k: (k, n)),   # W^T  (streamed)
                pl.BlockSpec((tk, tn), lambda n, k: (k, n)),   # NW^T (streamed)
                pl.BlockSpec((1, tn), lambda n, k: (0, n)),    # bias (f32)
                pl.BlockSpec((1, tn), lambda n, k: (0, n)),    # noisy_bias (f32)
                pl.BlockSpec((1, tk), lambda n, k: (0, k)),    # f(eps_in) (f32)
                pl.BlockSpec((1, tn), lambda n, k: (0, n)),    # f(eps_out) (f32)
            ],
            out_specs=pl.BlockSpec((Bp, tn), lambda n, k: (0, n)),
            scratch_shapes=[pltpu.VMEM((Bp, tn), jnp.float32)],
        ),
        compiler_params=compiler_params,
    )(x_p, params["wT"], params["nwT"], params["b"], params["nb"],
      ein_p, eout_p)

    return out_p[:B, :out_f]


# --------------------------------------------------------------------------- #
# Parameter init mirroring NoisyLinear.reset_parameters().
# --------------------------------------------------------------------------- #
def init_noisy_linear_params(key, in_features, out_features,
                             initial_sigma=INIT_SIGMA, factorized=FACTORIZED):
    kw, kb = jax.random.split(key)
    if factorized:
        sqrt_in = math.sqrt(in_features)
        bound = 1.0 / sqrt_in
        noisy_const = initial_sigma / sqrt_in
    else:
        bound = math.sqrt(3.0 / in_features)
        noisy_const = initial_sigma
    weight = jax.random.uniform(kw, (out_features, in_features),
                                minval=-bound, maxval=bound, dtype=jnp.float32)
    noisy_weight = jnp.full((out_features, in_features), noisy_const, jnp.float32)
    bias = jax.random.uniform(kb, (out_features,),
                              minval=-bound, maxval=bound, dtype=jnp.float32)
    noisy_bias = jnp.full((out_features,), noisy_const, jnp.float32)
    return weight, noisy_weight, bias, noisy_bias


def _reference(x, weight, noisy_weight, bias, noisy_bias, eps_in_raw, eps_out_raw):
    ei = _f_transform(eps_in_raw.astype(jnp.float32))
    eo = _f_transform(eps_out_raw.astype(jnp.float32))
    w = weight.astype(jnp.float32)
    nw = noisy_weight.astype(jnp.float32)
    w_eff = w + nw * (eo[:, None] * ei[None, :])
    b_eff = bias.astype(jnp.float32) + noisy_bias.astype(jnp.float32) * eo
    return x.astype(jnp.float32) @ w_eff.T + b_eff


if __name__ == "__main__":
    key = jax.random.PRNGKey(0)
    k_param, k_x, k_ein, k_eout = jax.random.split(key, 4)

    batch, in_features, out_features = 4, 32, 64

    weight, noisy_weight, bias, noisy_bias = init_noisy_linear_params(
        k_param, in_features, out_features)

    x = jax.random.normal(k_x, (batch, in_features), dtype=jnp.float32)
    # Raw gaussians for the factorized noise (drawn once per forward, as in torch).
    eps_in_raw = jax.random.normal(k_ein, (in_features,), dtype=jnp.float32)
    eps_out_raw = jax.random.normal(k_eout, (out_features,), dtype=jnp.float32)

    ref = _reference(x, weight, noisy_weight, bias, noisy_bias,
                     eps_in_raw, eps_out_raw)

    # --- f32 path: exact check against the reference ------------------------
    params_f32 = prepare_noisy_linear_params(
        weight, noisy_weight, bias, noisy_bias, param_dtype=jnp.float32)
    out_f32 = noisy_linear_forward(x, params_f32, eps_in_raw, eps_out_raw)
    out_f32 = jax.block_until_ready(out_f32)
    assert out_f32.shape == (batch, out_features)
    assert jnp.allclose(out_f32, ref, atol=1e-5, rtol=1e-5), "f32 mismatch vs reference"

    # --- bf16 default path: params prepared ONCE, reused across forwards ----
    params_bf16 = prepare_noisy_linear_params(weight, noisy_weight, bias, noisy_bias)
    out_bf16 = noisy_linear_forward(x.astype(jnp.bfloat16), params_bf16,
                                    eps_in_raw, eps_out_raw)
    out_bf16 = jax.block_until_ready(out_bf16)
    assert out_bf16.shape == (batch, out_features)
    assert jnp.allclose(out_bf16.astype(jnp.float32), ref,
                        atol=5e-2, rtol=5e-2), "bf16 mismatch vs reference"

    print("KERNEL_OK")
</pallas_src>

<mosaic_0001>
module attributes {stable_mosaic.version = 11 : i64} {
  func.func @_noisy_linear_kernel(%arg0: i32, %arg1: i32, %arg2: memref<8x128xf32, #tpu.memory_space<vmem>>, %arg3: memref<128x128xf32, #tpu.memory_space<vmem>>, %arg4: memref<128x128xf32, #tpu.memory_space<vmem>>, %arg5: memref<1x128xf32, #tpu.memory_space<vmem>>, %arg6: memref<1x128xf32, #tpu.memory_space<vmem>>, %arg7: memref<1x128xf32, #tpu.memory_space<vmem>>, %arg8: memref<1x128xf32, #tpu.memory_space<vmem>>, %arg9: memref<8x128xf32, #tpu.memory_space<vmem>>, %arg10: memref<8x128xf32, #tpu.memory_space<vmem>>) attributes {dimension_semantics = [#tpu.dimension_semantics<parallel>, #tpu.dimension_semantics<arbitrary>], iteration_bounds = array<i64: 1, 1>, scalar_prefetch = 0 : i64, scratch_operands = 1 : i64, tpu.core_type = #tpu.core_type<tc>, window_params = [{transform_indices = @transform_0, window_bounds = array<i64: 8, 128>}, {transform_indices = @transform_1, window_bounds = array<i64: 128, 128>}, {transform_indices = @transform_2, window_bounds = array<i64: 128, 128>}, {transform_indices = @transform_3, window_bounds = array<i64: 1, 128>}, {transform_indices = @transform_4, window_bounds = array<i64: 1, 128>}, {transform_indices = @transform_5, window_bounds = array<i64: 1, 128>}, {transform_indices = @transform_6, window_bounds = array<i64: 1, 128>}, {transform_indices = @transform_7, window_bounds = array<i64: 8, 128>}]} {
    %c0_i32 = arith.constant 0 : i32
    %0 = arith.cmpi eq, %arg1, %c0_i32 : i32
    %1 = arith.extui %0 : i1 to i32
    %c0_i32_0 = arith.constant 0 : i32
    %2 = arith.cmpi ne, %1, %c0_i32_0 : i32
    scf.if %2 {
      %cst_17 = arith.constant 0.000000e+00 : f32
      %21 = vector.broadcast %cst_17 : f32 to vector<8x128xf32>
      %c0_18 = arith.constant 0 : index
      %c0_19 = arith.constant 0 : index
      %22 = vector.load %arg10[%c0_18, %c0_19] : memref<8x128xf32, #tpu.memory_space<vmem>>, vector<8x128xf32>
      tpu.vector_store %arg10[%c0_18, %c0_19], %21 {strides = array<i32>} : memref<8x128xf32, #tpu.memory_space<vmem>>, vector<8x128xf32>,
    } else {
    }
    %c0 = arith.constant 0 : index
    %c0_1 = arith.constant 0 : index
    %3 = vector.load %arg2[%c0, %c0_1] : memref<8x128xf32, #tpu.memory_space<vmem>>, vector<8x128xf32>
    %c0_2 = arith.constant 0 : index
    %c0_3 = arith.constant 0 : index
    %4 = vector.load %arg7[%c0_2, %c0_3] : memref<1x128xf32, #tpu.memory_space<vmem>>, vector<1x128xf32>
    %c0_4 = arith.constant 0 : index
    %c0_5 = arith.constant 0 : index
    %5 = vector.load %arg8[%c0_4, %c0_5] : memref<1x128xf32, #tpu.memory_space<vmem>>, vector<1x128xf32>
    %c0_6 = arith.constant 0 : index
    %c0_7 = arith.constant 0 : index
    %6 = vector.load %arg3[%c0_6, %c0_7] : memref<128x128xf32, #tpu.memory_space<vmem>>, vector<128x128xf32>
    %cst = arith.constant dense<0.000000e+00> : vector<8x128xf32>
    %7 = tpu.matmul %3, %6, %cst {dimension_numbers = #tpu.dot_dimension_numbers<[1], [0], [0], [1], [0, 0, 1, 1], [], []>} : vector<8x128xf32>, vector<128x128xf32>, vector<8x128xf32> -> vector<8x128xf32>
    %8 = vector.broadcast %4 : vector<1x128xf32> to vector<8x128xf32>
    %9 = arith.mulf %3, %8 : vector<8x128xf32>
    %c0_8 = arith.constant 0 : index
    %c0_9 = arith.constant 0 : index
    %10 = vector.load %arg4[%c0_8, %c0_9] : memref<128x128xf32, #tpu.memory_space<vmem>>, vector<128x128xf32>
    %cst_10 = arith.constant dense<0.000000e+00> : vector<8x128xf32>
    %11 = tpu.matmul %9, %10, %cst_10 {dimension_numbers = #tpu.dot_dimension_numbers<[1], [0], [0], [1], [0, 0, 1, 1], [], []>} : vector<8x128xf32>, vector<128x128xf32>, vector<8x128xf32> -> vector<8x128xf32>
    %12 = vector.broadcast %5 : vector<1x128xf32> to vector<8x128xf32>
    %13 = arith.mulf %12, %11 : vector<8x128xf32>
    %14 = arith.addf %7, %13 : vector<8x128xf32>
    %c0_11 = arith.constant 0 : index
    %c0_12 = arith.constant 0 : index
    %15 = vector.load %arg10[%c0_11, %c0_12] : memref<8x128xf32, #tpu.memory_space<vmem>>, vector<8x128xf32>
    %16 = arith.addf %15, %14 : vector<8x128xf32>
    %c0_13 = arith.constant 0 : index
    %c0_14 = arith.constant 0 : index
    %17 = vector.load %arg10[%c0_13, %c0_14] : memref<8x128xf32, #tpu.memory_space<vmem>>, vector<8x128xf32>
    tpu.vector_store %arg10[%c0_13, %c0_14], %16 {strides = array<i32>} : memref<8x128xf32, #tpu.memory_space<vmem>>, vector<8x128xf32>,
    %c0_i32_15 = arith.constant 0 : i32
    %18 = arith.cmpi eq, %arg1, %c0_i32_15 : i32
    %19 = arith.extui %18 : i1 to i32
    %c0_i32_16 = arith.constant 0 : i32
    %20 = arith.cmpi ne, %19, %c0_i32_16 : i32
    scf.if %20 {
      %c0_17 = arith.constant 0 : index
      %c0_18 = arith.constant 0 : index
      %21 = vector.load %arg5[%c0_17, %c0_18] : memref<1x128xf32, #tpu.memory_space<vmem>>, vector<1x128xf32>
      %c0_19 = arith.constant 0 : index
      %c0_20 = arith.constant 0 : index
      %22 = vector.load %arg6[%c0_19, %c0_20] : memref<1x128xf32, #tpu.memory_space<vmem>>, vector<1x128xf32>
      %23 = arith.mulf %22, %5 : vector<1x128xf32>
      %24 = arith.addf %21, %23 : vector<1x128xf32>
      %c0_21 = arith.constant 0 : index
      %c0_22 = arith.constant 0 : index
      %25 = vector.load %arg10[%c0_21, %c0_22] : memref<8x128xf32, #tpu.memory_space<vmem>>, vector<8x128xf32>
      %26 = vector.broadcast %24 : vector<1x128xf32> to vector<8x128xf32>
      %27 = arith.addf %25, %26 : vector<8x128xf32>
      %c0_23 = arith.constant 0 : index
      %c0_24 = arith.constant 0 : index
      %28 = vector.load %arg9[%c0_23, %c0_24] : memref<8x128xf32, #tpu.memory_space<vmem>>, vector<8x128xf32>
      tpu.vector_store %arg9[%c0_23, %c0_24], %27 {strides = array<i32>} : memref<8x128xf32, #tpu.memory_space<vmem>>, vector<8x128xf32>,
    } else {
    }
    return
  }
  func.func @transform_0(%arg0: i32, %arg1: i32) -> (i32, i32) {
    %c0_i32 = arith.constant 0 : i32
    %c0_i32_0 = arith.constant 0 : i32
    return %c0_i32, %arg1 : i32, i32
  }
  func.func @transform_1(%arg0: i32, %arg1: i32) -> (i32, i32) {
    %c0_i32 = arith.constant 0 : i32
    return %arg1, %arg0 : i32, i32
  }
  func.func @transform_2(%arg0: i32, %arg1: i32) -> (i32, i32) {
    %c0_i32 = arith.constant 0 : i32
    return %arg1, %arg0 : i32, i32
  }
  func.func @transform_3(%arg0: i32, %arg1: i32) -> (i32, i32) {
    %c0_i32 = arith.constant 0 : i32
    %c0_i32_0 = arith.constant 0 : i32
    return %c0_i32, %arg0 : i32, i32
  }
  func.func @transform_4(%arg0: i32, %arg1: i32) -> (i32, i32) {
    %c0_i32 = arith.constant 0 : i32
    %c0_i32_0 = arith.constant 0 : i32
    return %c0_i32, %arg0 : i32, i32
  }
  func.func @transform_5(%arg0: i32, %arg1: i32) -> (i32, i32) {
    %c0_i32 = arith.constant 0 : i32
    %c0_i32_0 = arith.constant 0 : i32
    return %c0_i32, %arg1 : i32, i32
  }
  func.func @transform_6(%arg0: i32, %arg1: i32) -> (i32, i32) {
    %c0_i32 = arith.constant 0 : i32
    %c0_i32_0 = arith.constant 0 : i32
    return %c0_i32, %arg0 : i32, i32
  }
  func.func @transform_7(%arg0: i32, %arg1: i32) -> (i32, i32) {
    %c0_i32 = arith.constant 0 : i32
    %c0_i32_0 = arith.constant 0 : i32
    return %c0_i32, %arg0 : i32, i32
  }
}

</mosaic_0001>

<bundles_post_ra>
// kernel: tpu_custom_call.1
= control target key start
LH: loop header
LB: loop body
LE: loop exit
PB: predicated region body
PF: predicated region fallthrough
CT: control target
= control target key end

     0   :  { %12 = vsyncpa [#allocation4], 0  ;;  %s682_s0 = inlined_call_operand.hbm [shape: f32[8,128], index: 0, kind: input, shape index: {}]   ;;  %s683_s1 = inlined_call_operand.hbm [shape: f32[128,128], index: 1, kind: input, shape index: {}]   ;;  %s684_s2 = inlined_call_operand.hbm [shape: f32[128,128], index: 2, kind: input, shape index: {}]   ;;  %s685_s3 = inlined_call_operand.vmem [shape: f32[1,128], index: 3, kind: input, shape index: {}]   ;;  %s686_s4 = inlined_call_operand.vmem [shape: f32[1,128], index: 4, kind: input, shape index: {}]   ;;  %s687_s5 = inlined_call_operand.vmem [shape: f32[1,128], index: 5, kind: input, shape index: {}]   ;;  %s688_s6 = inlined_call_operand.vmem [shape: f32[1,128], index: 6, kind: input, shape index: {}]   ;;  %s689_s7 = inlined_call_operand.hbm [shape: f32[8,128], index: 7, kind: output, shape index: {}]  }
   0x1   :  { %13 = vsyncpa [#allocation7], 0 }
   0x2   :  { %14 = vsyncpa [#allocation5], 0  ;;  %s551_s24 = smov [#allocation6]   ;;  %s457_s28 = scalar_lea.hbm %s683_s1, 2048 }
   0x3   :  { %s30_s25 = sshll.u32 %s551_s24, 4  ;;  %p458_p0 = scmp.ne.s32.totalorder %s683_s1, %s457_s28  ;;  %s31_s25 = int_to_ptr.vmem [resolvable:$true] %s30_s25 }
   0x4   :  { %p461_p1 = scmp.lt.u32.totalorder %s457_s28, %s683_s1 }
   0x6   :  { %p463_p2 = pnand %p461_p1, %p458_p0 }
   0x8   :  { %466 = shalt.err (!%p463_p2)
}
   0x9   :  { %s467_s10 = scalar_lea.vmem %s31_s25, 2048  ;;  %p472_p4 = scmp.lt.s32.totalorder %s31_s25, %s31_s25 }
   0xa   :  { %p468_p3 = scmp.ne.s32.totalorder %s31_s25, %s467_s10  ;;  %p473_p5 = scmp.lt.s32.totalorder %s467_s10, %s467_s10 }
   0xc   :  { %p474_p6 = por %p473_p5, %p472_p4 }
   0xe   :  { %p475_p7 = pnand %p474_p6, %p468_p3 }
  0x10   :  { %478 = shalt.err (!%p475_p7)
}
  0x11   :  { %s552_s11 = smov 128   ;;  %s553_s12 = smov 8  }
  0x12   :  { %36 = dma.hbm_to_vmem [thread:$0]  %s683_s1, 2048, %s31_s25, [#allocation7], %s552_s11, %s552_s11, %s553_s12  }
  0x13   :  { %s554_s15 = smov [#allocation3]   ;;  %s555_s17 = smov [#allocation8]  }
  0x14   :  { %s21_s16 = sshll.u32 %s554_s15, 4  ;;  %s42_s18 = sshll.u32 %s555_s17, 4  ;;  %s22_s16 = int_to_ptr.vmem [resolvable:$true] %s21_s16  ;;  %s43_s18 = int_to_ptr.vmem [resolvable:$true] %s42_s18 }
  0x15   :  { %s479_s21 = scalar_lea.hbm %s682_s0, 128 }
  0x16   :  { %p480_p8 = scmp.ne.s32.totalorder %s682_s0, %s479_s21  ;;  %p483_p9 = scmp.lt.u32.totalorder %s479_s21, %s682_s0 }
  0x18   :  { %p485_p10 = pnand %p483_p9, %p480_p8 }
  0x1a   :  { %488 = shalt.err (!%p485_p10)
}
  0x1b   :  { %s489_s1 = scalar_lea.vmem %s22_s16, 128  ;;  %p494_p12 = scmp.lt.s32.totalorder %s22_s16, %s22_s16 }
  0x1c   :  { %p490_p11 = scmp.ne.s32.totalorder %s22_s16, %s489_s1  ;;  %p495_p13 = scmp.lt.s32.totalorder %s489_s1, %s489_s1 }
  0x1e   :  { %p496_p0 = por %p495_p13, %p494_p12 }
  0x20   :  { %p497_p1 = pnand %p496_p0, %p490_p11 }
  0x22   :  { %500 = shalt.err (!%p497_p1)
}
  0x23   :  { %24 = dma.hbm_to_vmem [thread:$0]  %s682_s0, 128, %s22_s16, [#allocation4]  }
  0x24   :  { %s501_s30 = scalar_lea.hbm %s684_s2, 2048 }
  0x25   :  { %p502_p2 = scmp.ne.s32.totalorder %s684_s2, %s501_s30  ;;  %p505_p3 = scmp.lt.u32.totalorder %s501_s30, %s684_s2 }
  0x27   :  { %p507_p4 = pnand %p505_p3, %p502_p2 }
  0x29   :  { %510 = shalt.err (!%p507_p4)
}
  0x2a   :  { %s511_s14 = scalar_lea.vmem %s43_s18, 2048  ;;  %p516_p6 = scmp.lt.s32.totalorder %s43_s18, %s43_s18 }
  0x2b   :  { %p512_p5 = scmp.ne.s32.totalorder %s43_s18, %s511_s14  ;;  %p517_p7 = scmp.lt.s32.totalorder %s511_s14, %s511_s14 }
  0x2d   :  { %p518_p8 = por %p517_p7, %p516_p6 }
  0x2f   :  { %p519_p9 = pnand %p518_p8, %p512_p5 }
  0x31   :  { %522 = shalt.err (!%p519_p9)
}
  0x32   :  { %48 = dma.hbm_to_vmem [thread:$0]  %s684_s2, 2048, %s43_s18, [#allocation7], %s552_s11, %s552_s11, %s553_s12  }
  0x33   :  { %545 = dma.done.wait [#allocation4], 128  }
  0x34   :  { %546 = vsyncadd [#allocation4], 4294967168 }
  0x35   :  { %547 = dma.done.wait [#allocation7], 4096  }
  0x36   :  { %548 = vsyncadd [#allocation7], 4294963200  ;;  %v556_v0 = vmov 0.0|0.0   ;;  %vm557_vm0 = vmmov 0   ;;  %v558_v1 = vmov 0.0   ;;  %v97_v2 = vld [vmem:[#allocation8] sm:$0xff]  ;;  %v184_v53 = vlaneseq }
  0x37   :  { %400 = vmatprep.subr.bf16.mxu0 %v556_v0  ;;  %424 = vmatprep.subr.bf16.mxu1 %v556_v0  ;;  %v98_v3 = vld [vmem:[#allocation8 + $0x8] sm:$0xff]  ;;  %v74_v4 = vld [vmem:[#allocation6] sm:$0xff]  ;;  %v99_v7 = vld [vmem:[#allocation8 + $0x10] sm:$0xff]  ;;  %s559_s20 = smov [#allocation9]  }
  0x38   :  { %362 = vmatprep.mubr.msk.f32.mxu0 %vm557_vm0, %v558_v1  ;;  %397 = vmatprep.mubr.msk.f32.mxu1 %vm557_vm0, %v558_v1  ;;  %v401_v5 = vpack.c.bf16 %v98_v3, %v97_v2  ;;  %v75_v6 = vld [vmem:[#allocation6 + $0x8] sm:$0xff]  ;;  %v100_v8 = vld [vmem:[#allocation8 + $0x18] sm:$0xff]  ;;  %v76_v10 = vld [vmem:[#allocation6 + $0x10] sm:$0xff]  ;;  %v185_v54 = vshrl.u32 %v184_v53, 7 }
  0x39   :  { %v425_v9 = vpack.c.bf16 %v75_v6, %v74_v4  ;;  %v77_v11 = vld [vmem:[#allocation6 + $0x18] sm:$0xff]  ;;  %v404_v12 = vpack.c.bf16 %v100_v8, %v99_v7  ;;  %v101_v14 = vld [vmem:[#allocation8 + $0x20] sm:$0xff]  ;;  %v102_v15 = vld [vmem:[#allocation8 + $0x28] sm:$0xff] }
  0x3a   :  { %402 = vmatpush3.bf16.msra.mxu0 %v401_v5  ;;  %v428_v13 = vpack.c.bf16 %v77_v11, %v76_v10  ;;  %v78_v16 = vld [vmem:[#allocation6 + $0x20] sm:$0xff]  ;;  %v79_v17 = vld [vmem:[#allocation6 + $0x28] sm:$0xff]  ;;  %v407_v18 = vpack.c.bf16 %v102_v15, %v101_v14  ;;  %v103_v20 = vld [vmem:[#allocation8 + $0x30] sm:$0xff]  ;;  %v186_v57 = vsub.s32 0, %v185_v54 }
  0x3b   :  { %426 = vmatpush3.bf16.msra.mxu1 %v425_v9  ;;  %403 = vmatprep.subr.bf16.mxu0 %v556_v0  ;;  %v431_v19 = vpack.c.bf16 %v79_v17, %v78_v16  ;;  %v104_v21 = vld [vmem:[#allocation8 + $0x38] sm:$0xff]  ;;  %v80_v22 = vld [vmem:[#allocation6 + $0x30] sm:$0xff]  ;;  %v105_v26 = vld [vmem:[#allocation8 + $0x40] sm:$0xff] }
  0x3c   :  { %427 = vmatprep.subr.bf16.mxu1 %v556_v0  ;;  %v81_v23 = vld [vmem:[#allocation6 + $0x38] sm:$0xff]  ;;  %v410_v24 = vpack.c.bf16 %v104_v21, %v103_v20  ;;  %v106_v27 = vld [vmem:[#allocation8 + $0x48] sm:$0xff]  ;;  %v82_v28 = vld [vmem:[#allocation6 + $0x40] sm:$0xff] }
  0x3d   :  { %v434_v25 = vpack.c.bf16 %v81_v23, %v80_v22  ;;  %v83_v29 = vld [vmem:[#allocation6 + $0x48] sm:$0xff]  ;;  %v413_v30 = vpack.c.bf16 %v106_v27, %v105_v26  ;;  %v107_v32 = vld [vmem:[#allocation8 + $0x50] sm:$0xff]  ;;  %v108_v33 = vld [vmem:[#allocation8 + $0x58] sm:$0xff] }
  0x3e   :  { %405 = vmatpush3.bf16.msra.mxu0 %v404_v12  ;;  %v437_v31 = vpack.c.bf16 %v83_v29, %v82_v28  ;;  %v84_v34 = vld [vmem:[#allocation6 + $0x50] sm:$0xff]  ;;  %v85_v35 = vld [vmem:[#allocation6 + $0x58] sm:$0xff]  ;;  %v416_v36 = vpack.c.bf16 %v108_v33, %v107_v32  ;;  %v109_v38 = vld [vmem:[#allocation8 + $0x60] sm:$0xff] }
  0x3f   :  { %429 = vmatpush3.bf16.msra.mxu1 %v428_v13  ;;  %406 = vmatprep.subr.bf16.mxu0 %v556_v0  ;;  %v440_v37 = vpack.c.bf16 %v85_v35, %v84_v34  ;;  %v110_v39 = vld [vmem:[#allocation8 + $0x68] sm:$0xff]  ;;  %v86_v40 = vld [vmem:[#allocation6 + $0x60] sm:$0xff]  ;;  %v111_v44 = vld [vmem:[#allocation8 + $0x70] sm:$0xff] }
  0x40   :  { %430 = vmatprep.subr.bf16.mxu1 %v556_v0  ;;  %v87_v41 = vld [vmem:[#allocation6 + $0x68] sm:$0xff]  ;;  %v419_v42 = vpack.c.bf16 %v110_v39, %v109_v38  ;;  %v112_v45 = vld [vmem:[#allocation8 + $0x78] sm:$0xff]  ;;  %v88_v46 = vld [vmem:[#allocation6 + $0x70] sm:$0xff] }
  0x41   :  { %v443_v43 = vpack.c.bf16 %v87_v41, %v86_v40  ;;  %v89_v47 = vld [vmem:[#allocation6 + $0x78] sm:$0xff]  ;;  %v422_v48 = vpack.c.bf16 %v112_v45, %v111_v44 }
  0x42   :  { %408 = vmatpush3.bf16.msra.mxu0 %v407_v18  ;;  %v71_v49 = vld [vmem:[#allocation3] sm:$0xff]  ;;  %v446_v51 = vpack.c.bf16 %v89_v47, %v88_v46 }
  0x43   :  { %432 = vmatpush3.bf16.msra.mxu1 %v431_v19  ;;  %409 = vmatprep.subr.bf16.mxu0 %v556_v0  ;;  %v295_v50 = vld [vmem:[%s687_s5] ss:$0 sm:$0xff] }
  0x44   :  { %433 = vmatprep.subr.bf16.mxu1 %v556_v0  ;;  %v96_v52 = vmul.f32 %v295_v50, %v71_v49  ;;  %v73_v55 = vld [vmem:[%s688_s6] sm:$0x1]  ;;  %s285_s6 = sshll.u32 %s559_s20, 4  ;;  %s286_s6 = int_to_ptr.vmem [resolvable:$true] %s285_s6 }
  0x45   :  { %v267_v56 = vld [vmem:[%s686_s4] sm:$0x1]  ;;  %v187_v60 = vrot.slane %v73_v55, %v186_v57  ;;  %s523_s4 = scalar_lea.vmem %s286_s6, 128  ;;  %p528_p11 = scmp.lt.s32.totalorder %s286_s6, %s286_s6 }
  0x46   :  { %411 = vmatpush3.bf16.msra.mxu0 %v410_v24  ;;  %v268_v58 = vmul.f32 %v267_v56, %v73_v55  ;;  %v266_v59 = vld [vmem:[%s685_s3] sm:$0x1]  ;;  %p524_p10 = scmp.ne.s32.totalorder %s286_s6, %s523_s4  ;;  %p529_p12 = scmp.lt.s32.totalorder %s523_s4, %s523_s4 }
  0x47   :  { %435 = vmatpush3.bf16.msra.mxu1 %v434_v25  ;;  %412 = vmatprep.subr.bf16.mxu0 %v556_v0 }
  0x48   :  { %436 = vmatprep.subr.bf16.mxu1 %v556_v0  ;;  %v269_v61 = vadd.f32 %v268_v58, %v266_v59  ;;  %p530_p13 = por %p529_p12, %p528_p11 }
  0x4a   :  { %414 = vmatpush3.bf16.msra.mxu0 %v413_v30  ;;  %v275_v2 = vrot.slane %v269_v61, %v186_v57  ;;  %p531_p0 = pnand %p530_p13, %p524_p10 }
  0x4b   :  { %438 = vmatpush3.bf16.msra.mxu1 %v437_v31  ;;  %415 = vmatprep.subr.bf16.mxu0 %v556_v0 }
  0x4c   :  { %439 = vmatprep.subr.bf16.mxu1 %v556_v0 }
  0x4e   :  { %417 = vmatpush3.bf16.msra.mxu0 %v416_v36 }
  0x4f   :  { %441 = vmatpush3.bf16.msra.mxu1 %v440_v37  ;;  %418 = vmatprep.subr.bf16.mxu0 %v556_v0 }
  0x50   :  { %442 = vmatprep.subr.bf16.mxu1 %v556_v0 }
  0x52   :  { %420 = vmatpush3.bf16.msra.mxu0 %v419_v42 }
  0x53   :  { %444 = vmatpush3.bf16.msra.mxu1 %v443_v43  ;;  %421 = vmatprep.subr.bf16.mxu0 %v556_v0 }
  0x54   :  { %445 = vmatprep.subr.bf16.mxu1 %v556_v0 }
  0x56   :  { %423 = vmatpush3.bf16.msra.mxu0 %v422_v48 }
  0x57   :  { %447 = vmatpush3.bf16.msra.mxu1 %v446_v51 }
  0x59   :  { %363 = vmatmul.mubr.f32.vlgmr.msra.gmra.mrb[0].mxu0 %v96_v52 }
  0x5a   :  { %398 = vmatmul.mubr.f32.vlgmr.msra.gmra.mrb[0].mxu1 %v71_v49 }
 0x12c   :  { %v179_v62 = vpop.f32.mrb[0].mxu0 }
 0x12d   :  { %v189_v63 = vmul.f32 %v187_v60, %v179_v62  ;;  %v364_v0 = vpop.f32.mrb[1].mxu0  ;;  %v256_v1 = vpop.f32.mrb[0].mxu1 }
 0x12e   :  { %v399_v3 = vpop.f32.mrb[1].mxu1 }
 0x12f   :  { %v257_v4 = vadd.f32 %v256_v1, %v189_v63 }
 0x131   :  { %v277_v5 = vadd.f32 %v275_v2, %v257_v4 }
 0x133   :  { %278 = vst [vmem:[#allocation9] sm:$0xff] %v277_v5 }
 0x134   :  { %534 = shalt.err (!%p531_p0)
}
 0x135   :  { %s535_s22 = scalar_lea.hbm %s689_s7, 128 }
 0x136   :  { %p536_p1 = scmp.ne.s32.totalorder %s689_s7, %s535_s22  ;;  %p539_p2 = scmp.lt.u32.totalorder %s535_s22, %s689_s7 }
 0x138   :  { %p541_p3 = pnand %p539_p2, %p536_p1 }
 0x13a   :  { %544 = shalt.err (!%p541_p3)
}
 0x13b   :  { %288 = dma.vmem_to_hbm [thread:$0]  %s286_s6, 128, %s689_s7, [#allocation5]  }
 0x13c   :  { %549 = dma.done.wait [#allocation5], 128  }
 0x13d   :  { %550 = vsyncadd [#allocation5], 4294967168 }
 0x13e   :  { %292 = vsyncpa [#allocation4], 1 }
 0x13f   :  { %293 = vsyncpa [#allocation7], 1 }
 0x140   :  { %294 = vsyncpa [#allocation5], 1 }

</bundles_post_ra>
